<compile_context>
chip_gen: v7x
topology: tpu7x:2x2x1
jax: 0.10.0
libtpu: 0.0.40
codegen_flags: <defaults>
</compile_context>

<pallas_src>
import jax
import jax.numpy as jnp
from jax import lax
from jax.experimental import pallas as pl
from jax.experimental.pallas import tpu as pltpu


# ----------------------------------------------------------------------------
# Fused wavefront kernel (whole forward pass, one invocation per batch tile)
# ----------------------------------------------------------------------------
def _make_wavefront_kernel(num_layers, hidden_sizes, seq_len, batch_tile,
                           input_size, mm_dtype):
    """Ref order: x, w_in_pad, bias_full, w_blk, w_fc, b_fc, out, u_scr, h_scr.

      x        : (T, BT, D)        time-major, batch tile
      w_in_pad : (D, Htot)         [W_ih0 | 0]   (mm_dtype)
      bias_full: (1, Htot)         [b0 | b1 | ...]  (b_ih + b_hh per layer)
      w_blk    : (Htot, Htot)      block bi-diagonal recurrent matrix (mm_dtype)
      w_fc     : (1, H_last)       b_fc: (1,) in SMEM
      out      : (BT, T)
      u_scr    : (T*BT, Htot) VMEM     h_scr: (T*BT, H_last) VMEM
    """
    L = num_layers
    Hs = list(hidden_sizes)
    Htot = sum(Hs)
    off = [0]
    for h in Hs:
        off.append(off[-1] + h)
    HL = Hs[-1]
    T, BT, D = seq_len, batch_tile, input_size

    def kernel(x_ref, win_ref, bias_ref, wblk_ref, wfc_ref, bfc_ref,
               out_ref, u_scr, h_scr):
        # Hoisted layer-0 input projection (one big MXU matmul, off the serial
        # chain).  Columns beyond H0 of w_in_pad are zero, so those segments
        # of u carry exactly the per-layer biases.
        x2d = x_ref[...].reshape(T * BT, D)
        u_scr[...] = (
            jnp.dot(x2d.astype(mm_dtype), win_ref[...],
                    preferred_element_type=jnp.float32)
            + bias_ref[...])                                   # (T*BT, Htot)

        wblk = wblk_ref[...]                                   # (Htot, Htot)

        # Wavefront state: segment i holds layer-i's hidden at time (s - i).
        state = jnp.zeros((BT, Htot), jnp.float32)
        for s in range(T + L - 1):                 # fully unrolled (static)
            idx = min(s, T - 1)                    # past T, u gives biases only
            pre = jnp.dot(state.astype(mm_dtype), wblk,
                          preferred_element_type=jnp.float32)  # (BT, Htot)
            new_state = jnp.tanh(pre + u_scr[pl.ds(idx * BT, BT), :])
            if s < L - 1:
                # Layers that have not started yet must keep a ZERO initial
                # hidden state (tanh(bias) otherwise leaks in).
                lane = lax.broadcasted_iota(jnp.int32, (BT, Htot), 1)
                new_state = jnp.where(lane < off[s + 1], new_state, 0.0)
            state = new_state
            t_last = s - (L - 1)                   # last layer's timestep
            if t_last >= 0:
                h_scr[pl.ds(t_last * BT, BT), :] = state[:, off[L - 1]:]
            # TODO(synk): training-mode inter-layer dropout not implemented
            # (identity in eval mode, matching module.eval() semantics).

        # Fused fc head (output_size == 1): one VPU multiply + lane reduce
        # over the whole block, one store of the (BT, T) slab.
        hl = h_scr[...].reshape(T, BT, HL)
        y = jnp.sum(hl * wfc_ref[...], axis=-1) + bfc_ref[0]   # (T, BT)
        out_ref[...] = jnp.transpose(y).astype(out_ref.dtype)  # (BT, T)

    return kernel


# ----------------------------------------------------------------------------
# Wrapper
# ----------------------------------------------------------------------------
def rnn_model_forward(x_bsd, params, matmul_dtype=jnp.float32, batch_tile=None):
    """x_bsd: (batch, seq, input_size), batch-first like PyTorch.
    Returns (batch, seq, 1).

    matmul_dtype: jnp.float32 (PyTorch-parity, default) or jnp.bfloat16
      (faster MXU path, ~1e-3-level relative error).
    batch_tile: None -> one tile.  On v7x with batch >= 16 set e.g. Bp // 2 to
      shard the (independent) batch rows across both TensorCores.
    """
    B, T, D = x_bsd.shape
    rnn_params = params["rnn"]
    w_fc, b_fc = params["fc"]                      # (1, H_last), (1,)
    L = len(rnn_params)
    Hs = [w_hh.shape[0] for (_, w_hh, _) in rnn_params]
    Htot = sum(Hs)
    HL = Hs[-1]
    assert w_fc.shape[0] == 1, "kernel fc path assumes output_size == 1"

    f32 = jnp.float32
    Bp = ((B + 7) // 8) * 8                        # pad batch to f32 sublanes
    BT = Bp if batch_tile is None else int(batch_tile)
    assert BT % 8 == 0 and Bp % BT == 0
    nb = Bp // BT

    # Time-major + batch-pad the (tiny) input once in XLA; all sizeable
    # intermediates live only inside the fused kernel (VMEM scratch).
    x_tbd = jnp.transpose(x_bsd.astype(f32), (1, 0, 2))        # (T, B, D)
    x_pad = jnp.zeros((T, Bp, D), f32).at[:, :B, :].set(x_tbd)

    # --- assemble the wavefront operands once, outside the kernel -----------
    # Layer-0 input-projection weight, zero-padded to the full wavefront width.
    w_in_pad = jnp.concatenate(
        [rnn_params[0][0].astype(f32), jnp.zeros((D, Htot - Hs[0]), f32)],
        axis=1)                                                # (D, Htot)
    # Combined biases (b_ih + b_hh) of every layer, one segment each.
    bias_full = jnp.concatenate([b.astype(f32) for (_, _, b) in rnn_params],
                                axis=1)                        # (1, Htot)
    # Block bi-diagonal recurrent matrix: diag = W_hh_i, super-diag = W_ih_{i+1}.
    rows = []
    for i in range(L):
        blocks = []
        for j in range(L):
            if j == i:
                blocks.append(rnn_params[i][1].astype(f32))          # W_hh_i
            elif j == i + 1:
                blocks.append(rnn_params[i + 1][0].astype(f32))      # W_ih_{i+1}
            else:
                blocks.append(jnp.zeros((Hs[i], Hs[j]), f32))
        rows.append(jnp.concatenate(blocks, axis=1))
    w_blk = jnp.concatenate(rows, axis=0)                      # (Htot, Htot)

    # Only the MXU operands are (optionally) cast; state/adds/tanh stay f32.
    w_in_pad = w_in_pad.astype(matmul_dtype)
    w_blk = w_blk.astype(matmul_dtype)

    kernel = _make_wavefront_kernel(L, Hs, T, BT, D, matmul_dtype)

    vmem = pltpu.MemorySpace.VMEM
    smem = pltpu.MemorySpace.SMEM
    out_pad = pl.pallas_call(
        kernel,
        out_shape=jax.ShapeDtypeStruct((Bp, T), f32),
        grid=(nb,),
        in_specs=[
            pl.BlockSpec((T, BT, D), lambda b: (0, b, 0)),     # x (batch-tiled)
            pl.BlockSpec(memory_space=vmem),                   # w_in_pad
            pl.BlockSpec(memory_space=vmem),                   # bias_full
            pl.BlockSpec(memory_space=vmem),                   # w_blk
            pl.BlockSpec(memory_space=vmem),                   # w_fc
            pl.BlockSpec(memory_space=smem),                   # b_fc (scalar)
        ],
        out_specs=pl.BlockSpec((BT, T), lambda b: (b, 0)),
        scratch_shapes=[
            pltpu.VMEM((T * BT, Htot), jnp.float32),           # hoisted u
            pltpu.VMEM((T * BT, HL), jnp.float32),             # last-layer h_t
        ],
        compiler_params=pltpu.CompilerParams(
            dimension_semantics=("parallel",)),
        # NOTE: u/h scratch grow ~linearly in T*BT*H; if scaled far up, chunk
        # the hoisted projection over time and/or raise vmem_limit_bytes
        # (v7x has 64 MiB physical VMEM vs 128 MiB on v5e/v6e).
    )(x_pad, w_in_pad, bias_full, w_blk, w_fc.astype(f32), b_fc.astype(f32))

    return out_pad[:B, :, None]                                # (B, T, 1)


# ----------------------------------------------------------------------------
# Parameter init mirroring PyTorch defaults: U(-1/sqrt(H), 1/sqrt(H))
# ----------------------------------------------------------------------------
def init_params(key, input_size=4, hidden_sizes=(128, 64), output_size=1):
    params = {"rnn": [], "fc": None}
    in_dim = input_size
    for h in hidden_sizes:
        key, k1, k2, k3, k4 = jax.random.split(key, 5)
        bound = 1.0 / (h ** 0.5)
        w_ih = jax.random.uniform(k1, (in_dim, h), jnp.float32, -bound, bound)
        w_hh = jax.random.uniform(k2, (h, h), jnp.float32, -bound, bound)
        b_ih = jax.random.uniform(k3, (h,), jnp.float32, -bound, bound)
        b_hh = jax.random.uniform(k4, (h,), jnp.float32, -bound, bound)
        params["rnn"].append((w_ih, w_hh, (b_ih + b_hh).reshape(1, h)))
        in_dim = h
    key, k1, k2 = jax.random.split(key, 3)
    bound = 1.0 / (in_dim ** 0.5)
    w_fc = jax.random.uniform(k1, (output_size, in_dim), jnp.float32,
                              -bound, bound)                   # PyTorch (O, H)
    b_fc = jax.random.uniform(k2, (output_size,), jnp.float32, -bound, bound)
    params["fc"] = (w_fc, b_fc)
    return params


# ----------------------------------------------------------------------------
# Pure-JAX reference (layer-by-layer, time-by-time) for the sanity check
# ----------------------------------------------------------------------------
def reference_forward(x_bsd, params):
    x = x_bsd.astype(jnp.float32)
    for (w_ih, w_hh, b) in params["rnn"]:
        B, T, _ = x.shape
        H = w_hh.shape[0]
        h = jnp.zeros((B, H), jnp.float32)
        ys = []
        for t in range(T):
            h = jnp.tanh(x[:, t, :] @ w_ih + h @ w_hh + b)
            ys.append(h)
        x = jnp.stack(ys, axis=1)
    w_fc, b_fc = params["fc"]
    return x @ w_fc.T + b_fc


if __name__ == "__main__":
    key = jax.random.PRNGKey(0)
    k_param, k_x = jax.random.split(key)

    batch, seq, input_size = 2, 8, 4
    hidden_sizes = (128, 64)
    output_size = 1

    params = init_params(k_param, input_size, hidden_sizes, output_size)
    x = jax.random.normal(k_x, (batch, seq, input_size), jnp.float32)

    fwd = jax.jit(rnn_model_forward,
                  static_argnames=("matmul_dtype", "batch_tile"))
    out = jax.block_until_ready(fwd(x, params))

    ref = reference_forward(x, params)
    assert out.shape == (batch, seq, output_size), out.shape
    max_err = float(jnp.max(jnp.abs(out - ref)))
    assert max_err < 3e-5, max_err

    print("KERNEL_OK")
</pallas_src>

<mosaic_0001>
module attributes {stable_mosaic.version = 11 : i64} {
  func.func @kernel(%arg0: i32, %arg1: memref<8x8x4xf32, #tpu.memory_space<vmem>>, %arg2: memref<4x192xf32, #tpu.memory_space<vmem>>, %arg3: memref<1x192xf32, #tpu.memory_space<vmem>>, %arg4: memref<192x192xf32, #tpu.memory_space<vmem>>, %arg5: memref<1x64xf32, #tpu.memory_space<vmem>>, %arg6: memref<1xf32, #tpu.memory_space<smem>>, %arg7: memref<8x8xf32, #tpu.memory_space<vmem>>, %arg8: memref<64x192xf32, #tpu.memory_space<vmem>>, %arg9: memref<64x64xf32, #tpu.memory_space<vmem>>) attributes {dimension_semantics = [#tpu.dimension_semantics<parallel>], iteration_bounds = array<i64: 1>, scalar_prefetch = 0 : i64, scratch_operands = 2 : i64, tpu.core_type = #tpu.core_type<tc>, window_params = [{transform_indices = @transform_0, window_bounds = array<i64: 8, 8, 4>}, {pipeline_mode = #tpu.pipeline_mode<synchronous>, transform_indices = @transform_1, window_bounds = array<i64: 4, 192>}, {pipeline_mode = #tpu.pipeline_mode<synchronous>, transform_indices = @transform_2, window_bounds = array<i64: 1, 192>}, {pipeline_mode = #tpu.pipeline_mode<synchronous>, transform_indices = @transform_3, window_bounds = array<i64: 192, 192>}, {pipeline_mode = #tpu.pipeline_mode<synchronous>, transform_indices = @transform_4, window_bounds = array<i64: 1, 64>}, {transform_indices = @transform_5, window_bounds = array<i64: 1>}, {transform_indices = @transform_6, window_bounds = array<i64: 8, 8>}]} {
    %c0 = arith.constant 0 : index
    %c0_0 = arith.constant 0 : index
    %c0_1 = arith.constant 0 : index
    %0 = vector.load %arg1[%c0, %c0_0, %c0_1] : memref<8x8x4xf32, #tpu.memory_space<vmem>>, vector<8x8x4xf32>
    %1 = vector.shape_cast %0 : vector<8x8x4xf32> to vector<64x4xf32>
    %c0_2 = arith.constant 0 : index
    %c0_3 = arith.constant 0 : index
    %2 = vector.load %arg2[%c0_2, %c0_3] : memref<4x192xf32, #tpu.memory_space<vmem>>, vector<4x192xf32>
    %cst = arith.constant dense<0.000000e+00> : vector<64x192xf32>
    %3 = tpu.matmul %1, %2, %cst {dimension_numbers = #tpu.dot_dimension_numbers<[1], [0], [0], [1], [0, 0, 1, 1], [], []>} : vector<64x4xf32>, vector<4x192xf32>, vector<64x192xf32> -> vector<64x192xf32>
    %c0_4 = arith.constant 0 : index
    %c0_5 = arith.constant 0 : index
    %4 = vector.load %arg3[%c0_4, %c0_5] : memref<1x192xf32, #tpu.memory_space<vmem>>, vector<1x192xf32>
    %5 = vector.broadcast %4 : vector<1x192xf32> to vector<64x192xf32>
    %6 = arith.addf %3, %5 : vector<64x192xf32>
    %c0_6 = arith.constant 0 : index
    %c0_7 = arith.constant 0 : index
    %7 = vector.load %arg8[%c0_6, %c0_7] : memref<64x192xf32, #tpu.memory_space<vmem>>, vector<64x192xf32>
    tpu.vector_store %arg8[%c0_6, %c0_7], %6 {strides = array<i32>} : memref<64x192xf32, #tpu.memory_space<vmem>>, vector<64x192xf32>,
    %c0_8 = arith.constant 0 : index
    %c0_9 = arith.constant 0 : index
    %8 = vector.load %arg4[%c0_8, %c0_9] : memref<192x192xf32, #tpu.memory_space<vmem>>, vector<192x192xf32>
    %cst_10 = arith.constant 0.000000e+00 : f32
    %9 = vector.broadcast %cst_10 : f32 to vector<8x192xf32>
    %cst_11 = arith.constant dense<0.000000e+00> : vector<8x192xf32>
    %10 = tpu.matmul %9, %8, %cst_11 {dimension_numbers = #tpu.dot_dimension_numbers<[1], [0], [0], [1], [0, 0, 1, 1], [], []>} : vector<8x192xf32>, vector<192x192xf32>, vector<8x192xf32> -> vector<8x192xf32>
    %c0_12 = arith.constant 0 : index
    %c0_13 = arith.constant 0 : index
    %11 = vector.load %arg8[%c0_12, %c0_13] : memref<64x192xf32, #tpu.memory_space<vmem>>, vector<8x192xf32>
    %12 = arith.addf %10, %11 : vector<8x192xf32>
    %13 = math.tanh %12 : vector<8x192xf32>
    %14 = tpu.iota {dimensions = array<i32: 1>} : vector<8x192xi32>
    %c128_i32 = arith.constant 128 : i32
    %15 = vector.broadcast %c128_i32 : i32 to vector<8x192xi32>
    %16 = arith.cmpi slt, %14, %15 : vector<8x192xi32>
    %cst_14 = arith.constant 0.000000e+00 : f32
    %17 = vector.broadcast %cst_14 : f32 to vector<8x192xf32>
    %18 = arith.select %16, %13, %17 : vector<8x192xi1>, vector<8x192xf32>
    %cst_15 = arith.constant dense<0.000000e+00> : vector<8x192xf32>
    %19 = tpu.matmul %18, %8, %cst_15 {dimension_numbers = #tpu.dot_dimension_numbers<[1], [0], [0], [1], [0, 0, 1, 1], [], []>} : vector<8x192xf32>, vector<192x192xf32>, vector<8x192xf32> -> vector<8x192xf32>
    %c8 = arith.constant 8 : index
    %c0_16 = arith.constant 0 : index
    %20 = vector.load %arg8[%c8, %c0_16] : memref<64x192xf32, #tpu.memory_space<vmem>>, vector<8x192xf32>
    %21 = arith.addf %19, %20 : vector<8x192xf32>
    %22 = math.tanh %21 : vector<8x192xf32>
    %23 = vector.extract_strided_slice %22 {offsets = [0, 128], sizes = [8, 64], strides = [1, 1]} : vector<8x192xf32> to vector<8x64xf32>
    %c0_17 = arith.constant 0 : index
    %c0_18 = arith.constant 0 : index
    %24 = vector.load %arg9[%c0_17, %c0_18] : memref<64x64xf32, #tpu.memory_space<vmem>>, vector<8x64xf32>
    tpu.vector_store %arg9[%c0_17, %c0_18], %23 {strides = array<i32>} : memref<64x64xf32, #tpu.memory_space<vmem>>, vector<8x64xf32>,
    %cst_19 = arith.constant dense<0.000000e+00> : vector<8x192xf32>
    %25 = tpu.matmul %22, %8, %cst_19 {dimension_numbers = #tpu.dot_dimension_numbers<[1], [0], [0], [1], [0, 0, 1, 1], [], []>} : vector<8x192xf32>, vector<192x192xf32>, vector<8x192xf32> -> vector<8x192xf32>
    %c16 = arith.constant 16 : index
    %c0_20 = arith.constant 0 : index
    %26 = vector.load %arg8[%c16, %c0_20] : memref<64x192xf32, #tpu.memory_space<vmem>>, vector<8x192xf32>
    %27 = arith.addf %25, %26 : vector<8x192xf32>
    %28 = math.tanh %27 : vector<8x192xf32>
    %29 = vector.extract_strided_slice %28 {offsets = [0, 128], sizes = [8, 64], strides = [1, 1]} : vector<8x192xf32> to vector<8x64xf32>
    %c8_21 = arith.constant 8 : index
    %c0_22 = arith.constant 0 : index
    %30 = vector.load %arg9[%c8_21, %c0_22] : memref<64x64xf32, #tpu.memory_space<vmem>>, vector<8x64xf32>
    tpu.vector_store %arg9[%c8_21, %c0_22], %29 {strides = array<i32>} : memref<64x64xf32, #tpu.memory_space<vmem>>, vector<8x64xf32>,
    %cst_23 = arith.constant dense<0.000000e+00> : vector<8x192xf32>
    %31 = tpu.matmul %28, %8, %cst_23 {dimension_numbers = #tpu.dot_dimension_numbers<[1], [0], [0], [1], [0, 0, 1, 1], [], []>} : vector<8x192xf32>, vector<192x192xf32>, vector<8x192xf32> -> vector<8x192xf32>
    %c24 = arith.constant 24 : index
    %c0_24 = arith.constant 0 : index
    %32 = vector.load %arg8[%c24, %c0_24] : memref<64x192xf32, #tpu.memory_space<vmem>>, vector<8x192xf32>
    %33 = arith.addf %31, %32 : vector<8x192xf32>
    %34 = math.tanh %33 : vector<8x192xf32>
    %35 = vector.extract_strided_slice %34 {offsets = [0, 128], sizes = [8, 64], strides = [1, 1]} : vector<8x192xf32> to vector<8x64xf32>
    %c16_25 = arith.constant 16 : index
    %c0_26 = arith.constant 0 : index
    %36 = vector.load %arg9[%c16_25, %c0_26] : memref<64x64xf32, #tpu.memory_space<vmem>>, vector<8x64xf32>
    tpu.vector_store %arg9[%c16_25, %c0_26], %35 {strides = array<i32>} : memref<64x64xf32, #tpu.memory_space<vmem>>, vector<8x64xf32>,
    %cst_27 = arith.constant dense<0.000000e+00> : vector<8x192xf32>
    %37 = tpu.matmul %34, %8, %cst_27 {dimension_numbers = #tpu.dot_dimension_numbers<[1], [0], [0], [1], [0, 0, 1, 1], [], []>} : vector<8x192xf32>, vector<192x192xf32>, vector<8x192xf32> -> vector<8x192xf32>
    %c32 = arith.constant 32 : index
    %c0_28 = arith.constant 0 : index
    %38 = vector.load %arg8[%c32, %c0_28] : memref<64x192xf32, #tpu.memory_space<vmem>>, vector<8x192xf32>
    %39 = arith.addf %37, %38 : vector<8x192xf32>
    %40 = math.tanh %39 : vector<8x192xf32>
    %41 = vector.extract_strided_slice %40 {offsets = [0, 128], sizes = [8, 64], strides = [1, 1]} : vector<8x192xf32> to vector<8x64xf32>
    %c24_29 = arith.constant 24 : index
    %c0_30 = arith.constant 0 : index
    %42 = vector.load %arg9[%c24_29, %c0_30] : memref<64x64xf32, #tpu.memory_space<vmem>>, vector<8x64xf32>
    tpu.vector_store %arg9[%c24_29, %c0_30], %41 {strides = array<i32>} : memref<64x64xf32, #tpu.memory_space<vmem>>, vector<8x64xf32>,
    %cst_31 = arith.constant dense<0.000000e+00> : vector<8x192xf32>
    %43 = tpu.matmul %40, %8, %cst_31 {dimension_numbers = #tpu.dot_dimension_numbers<[1], [0], [0], [1], [0, 0, 1, 1], [], []>} : vector<8x192xf32>, vector<192x192xf32>, vector<8x192xf32> -> vector<8x192xf32>
    %c40 = arith.constant 40 : index
    %c0_32 = arith.constant 0 : index
    %44 = vector.load %arg8[%c40, %c0_32] : memref<64x192xf32, #tpu.memory_space<vmem>>, vector<8x192xf32>
    %45 = arith.addf %43, %44 : vector<8x192xf32>
    %46 = math.tanh %45 : vector<8x192xf32>
    %47 = vector.extract_strided_slice %46 {offsets = [0, 128], sizes = [8, 64], strides = [1, 1]} : vector<8x192xf32> to vector<8x64xf32>
    %c32_33 = arith.constant 32 : index
    %c0_34 = arith.constant 0 : index
    %48 = vector.load %arg9[%c32_33, %c0_34] : memref<64x64xf32, #tpu.memory_space<vmem>>, vector<8x64xf32>
    tpu.vector_store %arg9[%c32_33, %c0_34], %47 {strides = array<i32>} : memref<64x64xf32, #tpu.memory_space<vmem>>, vector<8x64xf32>,
    %cst_35 = arith.constant dense<0.000000e+00> : vector<8x192xf32>
    %49 = tpu.matmul %46, %8, %cst_35 {dimension_numbers = #tpu.dot_dimension_numbers<[1], [0], [0], [1], [0, 0, 1, 1], [], []>} : vector<8x192xf32>, vector<192x192xf32>, vector<8x192xf32> -> vector<8x192xf32>
    %c48 = arith.constant 48 : index
    %c0_36 = arith.constant 0 : index
    %50 = vector.load %arg8[%c48, %c0_36] : memref<64x192xf32, #tpu.memory_space<vmem>>, vector<8x192xf32>
    %51 = arith.addf %49, %50 : vector<8x192xf32>
    %52 = math.tanh %51 : vector<8x192xf32>
    %53 = vector.extract_strided_slice %52 {offsets = [0, 128], sizes = [8, 64], strides = [1, 1]} : vector<8x192xf32> to vector<8x64xf32>
    %c40_37 = arith.constant 40 : index
    %c0_38 = arith.constant 0 : index
    %54 = vector.load %arg9[%c40_37, %c0_38] : memref<64x64xf32, #tpu.memory_space<vmem>>, vector<8x64xf32>
    tpu.vector_store %arg9[%c40_37, %c0_38], %53 {strides = array<i32>} : memref<64x64xf32, #tpu.memory_space<vmem>>, vector<8x64xf32>,
    %cst_39 = arith.constant dense<0.000000e+00> : vector<8x192xf32>
    %55 = tpu.matmul %52, %8, %cst_39 {dimension_numbers = #tpu.dot_dimension_numbers<[1], [0], [0], [1], [0, 0, 1, 1], [], []>} : vector<8x192xf32>, vector<192x192xf32>, vector<8x192xf32> -> vector<8x192xf32>
    %c56 = arith.constant 56 : index
    %c0_40 = arith.constant 0 : index
    %56 = vector.load %arg8[%c56, %c0_40] : memref<64x192xf32, #tpu.memory_space<vmem>>, vector<8x192xf32>
    %57 = arith.addf %55, %56 : vector<8x192xf32>
    %58 = math.tanh %57 : vector<8x192xf32>
    %59 = vector.extract_strided_slice %58 {offsets = [0, 128], sizes = [8, 64], strides = [1, 1]} : vector<8x192xf32> to vector<8x64xf32>
    %c48_41 = arith.constant 48 : index
    %c0_42 = arith.constant 0 : index
    %60 = vector.load %arg9[%c48_41, %c0_42] : memref<64x64xf32, #tpu.memory_space<vmem>>, vector<8x64xf32>
    tpu.vector_store %arg9[%c48_41, %c0_42], %59 {strides = array<i32>} : memref<64x64xf32, #tpu.memory_space<vmem>>, vector<8x64xf32>,
    %cst_43 = arith.constant dense<0.000000e+00> : vector<8x192xf32>
    %61 = tpu.matmul %58, %8, %cst_43 {dimension_numbers = #tpu.dot_dimension_numbers<[1], [0], [0], [1], [0, 0, 1, 1], [], []>} : vector<8x192xf32>, vector<192x192xf32>, vector<8x192xf32> -> vector<8x192xf32>
    %c56_44 = arith.constant 56 : index
    %c0_45 = arith.constant 0 : index
    %62 = vector.load %arg8[%c56_44, %c0_45] : memref<64x192xf32, #tpu.memory_space<vmem>>, vector<8x192xf32>
    %63 = arith.addf %61, %62 : vector<8x192xf32>
    %64 = math.tanh %63 : vector<8x192xf32>
    %65 = vector.extract_strided_slice %64 {offsets = [0, 128], sizes = [8, 64], strides = [1, 1]} : vector<8x192xf32> to vector<8x64xf32>
    %c56_46 = arith.constant 56 : index
    %c0_47 = arith.constant 0 : index
    %66 = vector.load %arg9[%c56_46, %c0_47] : memref<64x64xf32, #tpu.memory_space<vmem>>, vector<8x64xf32>
    tpu.vector_store %arg9[%c56_46, %c0_47], %65 {strides = array<i32>} : memref<64x64xf32, #tpu.memory_space<vmem>>, vector<8x64xf32>,
    %c0_48 = arith.constant 0 : index
    %c0_49 = arith.constant 0 : index
    %67 = vector.load %arg9[%c0_48, %c0_49] : memref<64x64xf32, #tpu.memory_space<vmem>>, vector<64x64xf32>
    %68 = vector.shape_cast %67 : vector<64x64xf32> to vector<8x8x64xf32>
    %c0_50 = arith.constant 0 : index
    %c0_51 = arith.constant 0 : index
    %69 = vector.load %arg5[%c0_50, %c0_51] : memref<1x64xf32, #tpu.memory_space<vmem>>, vector<1x64xf32>
    %70 = vector.shape_cast %69 : vector<1x64xf32> to vector<1x1x64xf32>
    %71 = vector.broadcast %70 : vector<1x1x64xf32> to vector<8x8x64xf32>
    %72 = arith.mulf %68, %71 : vector<8x8x64xf32>
    %cst_52 = arith.constant dense<0.000000e+00> : vector<8x8xf32>
    %73 = vector.multi_reduction <add>, %72, %cst_52 [2] : vector<8x8x64xf32> to vector<8x8xf32>
    %c0_53 = arith.constant 0 : index
    %74 = memref.load %arg6[%c0_53] : memref<1xf32, #tpu.memory_space<smem>>
    %75 = vector.broadcast %74 : f32 to vector<8x8xf32>
    %76 = arith.addf %73, %75 : vector<8x8xf32>
    %77 = tpu.transpose %76, [1, 0] : vector<8x8xf32> -> vector<8x8xf32>
    %c0_54 = arith.constant 0 : index
    %c0_55 = arith.constant 0 : index
    %78 = vector.load %arg7[%c0_54, %c0_55] : memref<8x8xf32, #tpu.memory_space<vmem>>, vector<8x8xf32>
    tpu.vector_store %arg7[%c0_54, %c0_55], %77 {strides = array<i32>} : memref<8x8xf32, #tpu.memory_space<vmem>>, vector<8x8xf32>,
    return
  }
  func.func @transform_0(%arg0: i32) -> (i32, i32, i32) {
    %c0_i32 = arith.constant 0 : i32
    %c0_i32_0 = arith.constant 0 : i32
    %c0_i32_1 = arith.constant 0 : i32
    return %c0_i32, %arg0, %c0_i32_0 : i32, i32, i32
  }
  func.func @transform_1(%arg0: i32) -> (i32, i32) {
    %c0_i32 = arith.constant 0 : i32
    %c0_i32_0 = arith.constant 0 : i32
    %c0_i32_1 = arith.constant 0 : i32
    return %c0_i32, %c0_i32_0 : i32, i32
  }
  func.func @transform_2(%arg0: i32) -> (i32, i32) {
    %c0_i32 = arith.constant 0 : i32
    %c0_i32_0 = arith.constant 0 : i32
    %c0_i32_1 = arith.constant 0 : i32
    return %c0_i32, %c0_i32_0 : i32, i32
  }
  func.func @transform_3(%arg0: i32) -> (i32, i32) {
    %c0_i32 = arith.constant 0 : i32
    %c0_i32_0 = arith.constant 0 : i32
    %c0_i32_1 = arith.constant 0 : i32
    return %c0_i32, %c0_i32_0 : i32, i32
  }
  func.func @transform_4(%arg0: i32) -> (i32, i32) {
    %c0_i32 = arith.constant 0 : i32
    %c0_i32_0 = arith.constant 0 : i32
    %c0_i32_1 = arith.constant 0 : i32
    return %c0_i32, %c0_i32_0 : i32, i32
  }
  func.func @transform_5(%arg0: i32) -> i32 {
    %c0_i32 = arith.constant 0 : i32
    %c0_i32_0 = arith.constant 0 : i32
    return %c0_i32 : i32
  }
  func.func @transform_6(%arg0: i32) -> (i32, i32) {
    %c0_i32 = arith.constant 0 : i32
    %c0_i32_0 = arith.constant 0 : i32
    return %arg0, %c0_i32 : i32, i32
  }
}

</mosaic_0001>

<bundles_post_ra>
// kernel: rnn_model_forward.1
= control target key start
LH: loop header
LB: loop body
LE: loop exit
PB: predicated region body
PF: predicated region fallthrough
CT: control target
= control target key end

     0   :  { %v1603_v3 = vmov 0.0   ;;  %vm72_vm0 = vcmask 1043456   ;;  %vm47_vm1 = vcmask 31744   ;;  %vm191_vm2 = vcmask 523264   ;;  %s2192_s3 = inlined_call_operand.vmem [shape: f32[192,192], index: 3, kind: input, shape index: {}]   ;;  %s2193_s1 = inlined_call_operand.vmem [shape: f32[4,192], index: 1, kind: input, shape index: {}]   ;;  %s2194_s0 = inlined_call_operand.vmem [shape: f32[8,8,4], index: 0, kind: input, shape index: {}]   ;;  %s2195_s2 = inlined_call_operand.vmem [shape: f32[1,192], index: 2, kind: input, shape index: {}]   ;;  %s2196_s4 = inlined_call_operand.vmem [shape: f32[1,64], index: 4, kind: input, shape index: {}]   ;;  %s2197_s5 = inlined_call_operand.<no memory space> [shape: f32[1], index: 5, kind: input, shape index: {}]   ;;  %s2198_s6 = inlined_call_operand.vmem [shape: f32[8,8], index: 6, kind: output, shape index: {}]  }
   0x1   :  { %v208_v0 = vld [vmem:[%s2192_s3 + $0x8] sm:$0xff]  ;;  %v210_v1 = vld [vmem:[%s2192_s3 + $0x18] sm:$0xff]  ;;  %v207_v2 = vld [vmem:[%s2192_s3] sm:$0xff]  ;;  %141 = vmatprep.mubr.f32.mxu0 %v1603_v3  ;;  %324 = vmatprep.mubr.f32.mxu1 %v1603_v3  ;;  %vm1066_vm3 = vcmask 1041409   ;;  %vm1068_vm4 = vcmask 1042434   ;;  %vm1070_vm5 = vcmask 1043459  }
   0x2   :  { %v1650_v4 = vpack.c.bf16 %v210_v1, %v208_v0  ;;  %v209_v5 = vld [vmem:[%s2192_s3 + $0x10] sm:$0xff]  ;;  %v212_v6 = vld [vmem:[%s2192_s3 + $0x28] sm:$0xff]  ;;  %v214_v7 = vld [vmem:[%s2192_s3 + $0x38] sm:$0xff]  ;;  %vm1072_vm6 = vcmask 1044484   ;;  %vm1074_vm7 = vcmask 1045509   ;;  %vm1076_vm8 = vcmask 1046534  }
   0x3   :  { %v1661_v8 = vpack.c.bf16 %v209_v5, %v207_v2  ;;  %v1663_v9 = vpack.c.bf16 %v214_v7, %v212_v6  ;;  %v211_v10 = vld [vmem:[%s2192_s3 + $0x20] sm:$0xff]  ;;  %v213_v11 = vld [vmem:[%s2192_s3 + $0x30] sm:$0xff]  ;;  %v216_v12 = vld [vmem:[%s2192_s3 + $0x48] sm:$0xff]  ;;  %vm1078_vm9 = vcmask 1047559   ;;  %vm1113_vm10 = vcmask 64512  }
   0x4   :  { %1138 = vmatprep.subr.bf16.mxu1 %v1650_v4  ;;  %v218_v13 = vld [vmem:[%s2192_s3 + $0x58] sm:$0xff]  ;;  %v1679_v14 = vpack.c.bf16 %v213_v11, %v211_v10  ;;  %v215_v16 = vld [vmem:[%s2192_s3 + $0x40] sm:$0xff]  ;;  %v217_v17 = vld [vmem:[%s2192_s3 + $0x50] sm:$0xff] }
   0x5   :  { %1140 = vmatpush1.bf16.msra.mxu1 %v1661_v8  ;;  %v1682_v15 = vpack.c.bf16 %v218_v13, %v216_v12  ;;  %v220_v18 = vld [vmem:[%s2192_s3 + $0x68] sm:$0xff]  ;;  %v222_v19 = vld [vmem:[%s2192_s3 + $0x78] sm:$0xff]  ;;  %v1697_v20 = vpack.c.bf16 %v217_v17, %v215_v16  ;;  %v219_v22 = vld [vmem:[%s2192_s3 + $0x60] sm:$0xff] }
   0x6   :  { %1142 = vmatprep.subr.bf16.mxu1 %v1663_v9  ;;  %v1700_v21 = vpack.c.bf16 %v222_v19, %v220_v18  ;;  %v221_v23 = vld [vmem:[%s2192_s3 + $0x70] sm:$0xff]  ;;  %v224_v24 = vld [vmem:[%s2192_s3 + $0x88] sm:$0xff]  ;;  %v226_v25 = vld [vmem:[%s2192_s3 + $0x98] sm:$0xff] }
   0x7   :  { %v1715_v26 = vpack.c.bf16 %v221_v23, %v219_v22  ;;  %v32_v27 = vld [vmem:[%s2193_s1] sm:$0xff]  ;;  %v1721_v28 = vpack.c.bf16 %v226_v25, %v224_v24  ;;  %v225_v30 = vld [vmem:[%s2192_s3 + $0x90] sm:$0xff]  ;;  %v228_v32 = vld [vmem:[%s2192_s3 + $0xa8] sm:$0xff] }
   0x8   :  { %v223_v29 = vld [vmem:[%s2192_s3 + $0x80] sm:$0xff]  ;;  %v46_v31 = vcombine.high %v32_v27, %v32_v27  ;;  %v230_v33 = vld [vmem:[%s2192_s3 + $0xb8] sm:$0xff]  ;;  %v229_v38 = vld [vmem:[%s2192_s3 + $0xb0] sm:$0xff] }
   0x9   :  { %1144 = vmatpush1.bf16.msra.mxu1 %v1679_v14  ;;  %v24_v34 = vld [vmem:[%s2194_s0] sm:$0xff]  ;;  %v1739_v35 = vpack.c.bf16 %v225_v30, %v223_v29  ;;  %v1742_v36 = vpack.c.bf16 %v230_v33, %v228_v32  ;;  %v232_v39 = vld [vmem:[%s2192_s3 + $0xc8] sm:$0xff]  ;;  %v234_v40 = vld [vmem:[%s2192_s3 + $0xd8] sm:$0xff]  ;;  %v35_v29 = vlaneseq }
   0xa   :  { %1146 = vmatprep.subr.bf16.mxu1 %v1682_v15  ;;  %1119 = vmatprep.subr.msk.mxu0 %vm72_vm0, %v46_v31  ;;  %v227_v37 = vld [vmem:[%s2192_s3 + $0xa0] sm:$0xff]  ;;  %v25_v41 = vld [vmem:[%s2194_s0 + $0x8] sm:$0xff]  ;;  %v1768_v43 = vpack.c.bf16 %v234_v40, %v232_v39  ;;  %v233_v45 = vld [vmem:[%s2192_s3 + $0xd0] sm:$0xff] }
   0xb   :  { %1120 = vmatpush1.msk.msra.mxu0 %vm72_vm0, %v32_v27  ;;  %v1764_v42 = vpack.c.bf16 %v229_v38, %v227_v37  ;;  %v231_v44 = vld [vmem:[%s2192_s3 + $0xc0] sm:$0xff]  ;;  %v236_v46 = vld [vmem:[%s2192_s3 + $0xe8] sm:$0xff]  ;;  %v238_v47 = vld [vmem:[%s2192_s3 + $0xf8] sm:$0xff]  ;;  %v1952_v30 = vshrl.u32 %v35_v29, 7 }
   0xc   :  { %1121 = vmatmul.mubr.msk.f32.vlgmr.msra.gmra.mrb[0].mxu0 %vm47_vm1, %v24_v34  ;;  %1186 = vmatprep.subr.bf16.mxu0 %v1650_v4  ;;  %v1786_v48 = vpack.c.bf16 %v233_v45, %v231_v44  ;;  %v1790_v49 = vpack.c.bf16 %v238_v47, %v236_v46  ;;  %v235_v50 = vld [vmem:[%s2192_s3 + $0xe0] sm:$0xff]  ;;  %v237_v51 = vld [vmem:[%s2192_s3 + $0xf0] sm:$0xff]  ;;  %v240_v52 = vld [vmem:[%s2192_s3 + $0x108] sm:$0xff] }
   0xd   :  { %1148 = vmatpush1.bf16.msra.mxu1 %v1697_v20  ;;  %147 = vmatprep.mubr.f32.mxu0 %v1603_v3  ;;  %v242_v53 = vld [vmem:[%s2192_s3 + $0x118] sm:$0xff]  ;;  %v1806_v54 = vpack.c.bf16 %v237_v51, %v235_v50  ;;  %v239_v56 = vld [vmem:[%s2192_s3 + $0x100] sm:$0xff]  ;;  %v241_v57 = vld [vmem:[%s2192_s3 + $0x110] sm:$0xff]  ;;  %v37_v31 = vsub.s32 0, %v1952_v30  ;;  %v41_v33 = vsub.s32 1, %v1952_v30 }
   0xe   :  { %1150 = vmatprep.subr.bf16.mxu1 %v1700_v21  ;;  %1188 = vmatpush1.bf16.msra.mxu0 %v1661_v8  ;;  %v1810_v55 = vpack.c.bf16 %v242_v53, %v240_v52  ;;  %v244_v58 = vld [vmem:[%s2192_s3 + $0x128] sm:$0xff]  ;;  %v246_v59 = vld [vmem:[%s2192_s3 + $0x138] sm:$0xff]  ;;  %v1826_v60 = vpack.c.bf16 %v241_v57, %v239_v56  ;;  %v243_v62 = vld [vmem:[%s2192_s3 + $0x120] sm:$0xff] }
   0xf   :  { %1190 = vmatprep.subr.bf16.mxu0 %v1663_v9  ;;  %v1830_v61 = vpack.c.bf16 %v246_v59, %v244_v58  ;;  %v245_v63 = vld [vmem:[%s2192_s3 + $0x130] sm:$0xff]  ;;  %v248_v0 = vld [vmem:[%s2192_s3 + $0x148] sm:$0xff]  ;;  %v250_v1 = vld [vmem:[%s2192_s3 + $0x158] sm:$0xff] }
  0x10   :  { %1122 = vmatmul.mubr.msk.f32.gmra.mrb[2].mxu0 %vm47_vm1, %v25_v41  ;;  %v1846_v2 = vpack.c.bf16 %v245_v63, %v243_v62  ;;  %v1850_v5 = vpack.c.bf16 %v250_v1, %v248_v0  ;;  %v247_v6 = vld [vmem:[%s2192_s3 + $0x140] sm:$0xff]  ;;  %v249_v7 = vld [vmem:[%s2192_s3 + $0x150] sm:$0xff]  ;;  %v252_v10 = vld [vmem:[%s2192_s3 + $0x168] sm:$0xff] }
  0x11   :  { %1152 = vmatpush1.bf16.msra.mxu1 %v1715_v26  ;;  %153 = vmatprep.mubr.f32.mxu0 %v1603_v3  ;;  %v254_v11 = vld [vmem:[%s2192_s3 + $0x178] sm:$0xff]  ;;  %v1866_v12 = vpack.c.bf16 %v249_v7, %v247_v6  ;;  %v251_v16 = vld [vmem:[%s2192_s3 + $0x160] sm:$0xff]  ;;  %v253_v17 = vld [vmem:[%s2192_s3 + $0x170] sm:$0xff] }
  0x12   :  { %1154 = vmatprep.subr.bf16.mxu1 %v1721_v28  ;;  %1192 = vmatpush1.bf16.msra.mxu0 %v1679_v14  ;;  %v1870_v13 = vpack.c.bf16 %v254_v11, %v252_v10  ;;  %v1880_v18 = vpack.c.bf16 %v253_v17, %v251_v16  ;;  %v26_v19 = vld [vmem:[%s2194_s0 + $0x10] sm:$0xff]  ;;  %v27_v22 = vld [vmem:[%s2194_s0 + $0x18] sm:$0xff]  ;;  %v28_v23 = vld [vmem:[%s2194_s0 + $0x20] sm:$0xff] }
  0x13   :  { %1194 = vmatprep.subr.bf16.mxu0 %v1682_v15  ;;  %v29_v24 = vld [vmem:[%s2194_s0 + $0x28] sm:$0xff]  ;;  %v30_v25 = vld [vmem:[%s2194_s0 + $0x30] sm:$0xff]  ;;  %v31_v27 = vld [vmem:[%s2194_s0 + $0x38] sm:$0xff] }
  0x14   :  { %1123 = vmatmul.mubr.msk.f32.gmra.mrb[4].mxu0 %vm47_vm1, %v26_v19  ;;  %v33_v32 = vld [vmem:[%s2195_s2] sm:$0x3] }
  0x15   :  { %1156 = vmatpush1.bf16.msra.mxu1 %v1739_v35  ;;  %159 = vmatprep.mubr.f32.mxu0 %v1603_v3  ;;  %v1959_v34 = vrot.slane %v33_v32, %v37_v31  ;;  %v1961_v37 = vrot.slane %v33_v32, %v41_v33 }
  0x16   :  { %1158 = vmatprep.subr.bf16.mxu1 %v1742_v36  ;;  %1196 = vmatpush1.bf16.msra.mxu0 %v1697_v20 }
  0x17   :  { %1198 = vmatprep.subr.bf16.mxu0 %v1700_v21 }
  0x18   :  { %1124 = vmatmul.mubr.msk.f32.gmra.mrb[6].mxu0 %vm47_vm1, %v27_v22 }
  0x19   :  { %1160 = vmatpush1.bf16.msra.mxu1 %v1764_v42  ;;  %165 = vmatprep.mubr.f32.mxu0 %v1603_v3 }
  0x1a   :  { %1162 = vmatprep.subr.bf16.mxu1 %v1768_v43  ;;  %1200 = vmatpush1.bf16.msra.mxu0 %v1715_v26 }
  0x1b   :  { %1202 = vmatprep.subr.bf16.mxu0 %v1721_v28 }
  0x1c   :  { %1125 = vmatmul.mubr.msk.f32.gmra.mrb[8].mxu0 %vm47_vm1, %v28_v23 }
  0x1d   :  { %1164 = vmatpush1.bf16.msra.mxu1 %v1786_v48  ;;  %171 = vmatprep.mubr.f32.mxu0 %v1603_v3 }
  0x1e   :  { %1166 = vmatprep.subr.bf16.mxu1 %v1790_v49  ;;  %1204 = vmatpush1.bf16.msra.mxu0 %v1739_v35 }
  0x1f   :  { %1206 = vmatprep.subr.bf16.mxu0 %v1742_v36 }
  0x20   :  { %1126 = vmatmul.mubr.msk.f32.gmra.mrb[10].mxu0 %vm47_vm1, %v29_v24 }
  0x21   :  { %1168 = vmatpush1.bf16.msra.mxu1 %v1806_v54  ;;  %177 = vmatprep.mubr.f32.mxu0 %v1603_v3 }
  0x22   :  { %1170 = vmatprep.subr.bf16.mxu1 %v1810_v55  ;;  %1208 = vmatpush1.bf16.msra.mxu0 %v1764_v42 }
  0x23   :  { %1210 = vmatprep.subr.bf16.mxu0 %v1768_v43 }
  0x24   :  { %1127 = vmatmul.mubr.msk.f32.gmra.mrb[12].mxu0 %vm47_vm1, %v30_v25 }
  0x25   :  { %1172 = vmatpush1.bf16.msra.mxu1 %v1826_v60  ;;  %183 = vmatprep.mubr.f32.mxu0 %v1603_v3 }
  0x26   :  { %1174 = vmatprep.subr.bf16.mxu1 %v1830_v61  ;;  %1212 = vmatpush1.bf16.msra.mxu0 %v1786_v48 }
  0x27   :  { %1214 = vmatprep.subr.bf16.mxu0 %v1790_v49 }
  0x28   :  { %1128 = vmatmul.mubr.msk.f32.gmra.mrb[14].mxu0 %vm47_vm1, %v31_v27 }
  0x29   :  { %1176 = vmatpush1.bf16.msra.mxu1 %v1846_v2  ;;  %409 = vmatprep.mubr.f32.mxu0 %v1603_v3 }
  0x2a   :  { %1178 = vmatprep.subr.bf16.mxu1 %v1850_v5  ;;  %1216 = vmatpush1.bf16.msra.mxu0 %v1806_v54 }
  0x2b   :  { %1218 = vmatprep.subr.bf16.mxu0 %v1810_v55 }
  0x2d   :  { %1180 = vmatpush1.bf16.msra.mxu1 %v1866_v12 }
  0x2e   :  { %1182 = vmatprep.subr.bf16.mxu1 %v1870_v13  ;;  %1220 = vmatpush1.bf16.msra.mxu0 %v1826_v60 }
  0x2f   :  { %1222 = vmatprep.subr.bf16.mxu0 %v1830_v61 }
  0x31   :  { %1184 = vmatpush1.bf16.msra.mxu1 %v1880_v18 }
  0x32   :  { %1234 = vmatprep.subr.bf16.mxu1 %v1650_v4  ;;  %1224 = vmatpush1.bf16.msra.mxu0 %v1846_v2 }
  0x33   :  { %1226 = vmatprep.subr.bf16.mxu0 %v1850_v5 }
  0x34   :  { %325 = vmatmul.mubr.f32.vlgmr.msra.gmra.mrb[0].mxu1 %v1603_v3 }
  0x35   :  { %1236 = vmatpush1.bf16.msra.mxu1 %v1661_v8 }
  0x36   :  { %1238 = vmatprep.subr.bf16.mxu1 %v1663_v9  ;;  %1228 = vmatpush1.bf16.msra.mxu0 %v1866_v12 }
  0x37   :  { %1230 = vmatprep.subr.bf16.mxu0 %v1870_v13 }
  0x39   :  { %1240 = vmatpush1.bf16.msra.mxu1 %v1679_v14 }
  0x3a   :  { %1242 = vmatprep.subr.bf16.mxu1 %v1682_v15  ;;  %1232 = vmatpush1.bf16.msra.mxu0 %v1880_v18 }
  0x3b   :  { %1282 = vmatprep.subr.bf16.mxu0 %v1650_v4 }
  0x3d   :  { %1244 = vmatpush1.bf16.msra.mxu1 %v1697_v20 }
  0x3e   :  { %1246 = vmatprep.subr.bf16.mxu1 %v1700_v21 }
  0x41   :  { %1248 = vmatpush1.bf16.msra.mxu1 %v1715_v26 }
  0x42   :  { %1250 = vmatprep.subr.bf16.mxu1 %v1721_v28 }
  0x45   :  { %1252 = vmatpush1.bf16.msra.mxu1 %v1739_v35 }
  0x46   :  { %1254 = vmatprep.subr.bf16.mxu1 %v1742_v36 }
  0x49   :  { %1256 = vmatpush1.bf16.msra.mxu1 %v1764_v42 }
  0x4a   :  { %1258 = vmatprep.subr.bf16.mxu1 %v1768_v43 }
  0x4d   :  { %1260 = vmatpush1.bf16.msra.mxu1 %v1786_v48 }
  0x4e   :  { %1262 = vmatprep.subr.bf16.mxu1 %v1790_v49 }
  0x51   :  { %1264 = vmatpush1.bf16.msra.mxu1 %v1806_v54 }
  0x52   :  { %1266 = vmatprep.subr.bf16.mxu1 %v1810_v55 }
  0x55   :  { %1268 = vmatpush1.bf16.msra.mxu1 %v1826_v60 }
  0x56   :  { %1270 = vmatprep.subr.bf16.mxu1 %v1830_v61 }
  0x59   :  { %1272 = vmatpush1.bf16.msra.mxu1 %v1846_v2 }
  0x5a   :  { %1274 = vmatprep.subr.bf16.mxu1 %v1850_v5 }
  0x5d   :  { %1276 = vmatpush1.bf16.msra.mxu1 %v1866_v12 }
  0x5e   :  { %1278 = vmatprep.subr.bf16.mxu1 %v1870_v13 }
  0x61   :  { %1280 = vmatpush1.bf16.msra.mxu1 %v1880_v18 }
  0x62   :  { %1330 = vmatprep.subr.bf16.mxu1 %v1650_v4 }
  0xdf   :  { %v143_v38 = vpop.f32.mrb[0].mxu0 }
  0xe0   :  { %v144_v39 = vadd.f32 %v143_v38, %v1959_v34  ;;  %v145_v3 = vpop.f32.mrb[1].mxu0 }
  0xe3   :  { %v149_v40 = vpop.f32.mrb[2].mxu0 }
  0xe4   :  { %v1965_v41 = vadd.f32 %v149_v40, %v1959_v34  ;;  %v151_v44 = vpop.f32.mrb[3].mxu0 }
  0xe5   :  { %v152_v45 = vadd.f32 %v151_v44, %v1961_v37 }
  0xe7   :  { %194 = vst.msk [vmem:[#allocation2 + $0x18] sm:$0xff] %vm191_vm2, %v152_v45  ;;  %v155_v52 = vpop.f32.mrb[4].mxu0 }
  0xe8   :  { %v1990_v53 = vadd.f32 %v155_v52, %v1959_v34  ;;  %v157_v56 = vpop.f32.mrb[5].mxu0 }
  0xe9   :  { %v158_v57 = vadd.f32 %v157_v56, %v1961_v37 }
  0xeb   :  { %196 = vst.msk [vmem:[#allocation2 + $0x28] sm:$0xff] %vm191_vm2, %v158_v57  ;;  %v161_v58 = vpop.f32.mrb[6].mxu0 }
  0xec   :  { %v1997_v59 = vadd.f32 %v161_v58, %v1959_v34  ;;  %v163_v62 = vpop.f32.mrb[7].mxu0 }
  0xed   :  { %v164_v63 = vadd.f32 %v163_v62, %v1961_v37 }
  0xef   :  { %198 = vst.msk [vmem:[#allocation2 + $0x38] sm:$0xff] %vm191_vm2, %v164_v63  ;;  %v167_v0 = vpop.f32.mrb[8].mxu0 }
  0xf0   :  { %v2004_v1 = vadd.f32 %v167_v0, %v1959_v34  ;;  %v169_v6 = vpop.f32.mrb[9].mxu0 }
  0xf1   :  { %v170_v7 = vadd.f32 %v169_v6, %v1961_v37 }
  0xf3   :  { %200 = vst.msk [vmem:[#allocation2 + $0x48] sm:$0xff] %vm191_vm2, %v170_v7  ;;  %v173_v10 = vpop.f32.mrb[10].mxu0 }
  0xf4   :  { %v2009_v11 = vadd.f32 %v173_v10, %v1959_v34  ;;  %v175_v16 = vpop.f32.mrb[11].mxu0 }
  0xf5   :  { %v176_v17 = vadd.f32 %v175_v16, %v1961_v37 }
  0xf6   :  { %v499_v7 = vld [vmem:[#allocation2 + $0x38] sm:$0xff] }
  0xf7   :  { %202 = vst.msk [vmem:[#allocation2 + $0x58] sm:$0xff] %vm191_vm2, %v176_v17  ;;  %v179_v19 = vpop.f32.mrb[12].mxu0 }
  0xf8   :  { %v2014_v22 = vadd.f32 %v179_v19, %v1959_v34  ;;  %v181_v23 = vpop.f32.mrb[13].mxu0 }
  0xf9   :  { %v182_v24 = vadd.f32 %v181_v23, %v1961_v37 }
  0xfb   :  { %204 = vst.msk [vmem:[#allocation2 + $0x68] sm:$0xff] %vm191_vm2, %v182_v24  ;;  %v185_v25 = vpop.f32.mrb[14].mxu0 }
  0xfc   :  { %v2019_v27 = vadd.f32 %v185_v25, %v1959_v34  ;;  %v187_v31 = vpop.f32.mrb[15].mxu0  ;;  %v2031_v34 = vld [vmem:[%s2196_s4] ss:$0 sm:$0xff] }
  0xfd   :  { %v188_v32 = vadd.f32 %v187_v31, %v1961_v37 }
  0xff   :  { %206 = vst.msk [vmem:[#allocation2 + $0x78] sm:$0xff] %vm191_vm2, %v188_v32  ;;  %v578_v32 = vld [vmem:[#allocation2 + $0x48] sm:$0xff] }
 0x107   :  { %v326_v46 = vpop.f32.mrb[0].mxu1 }
 0x108   :  { %v327_v47 = vadd.f32 %v326_v46, %v144_v39  ;;  %v328_v50 = vpop.f32.mrb[1].mxu1  ;;  %v341_v39 = vld [vmem:[#allocation2 + $0x18] sm:$0xff] }
 0x10a   :  { %1571 = vtanh.f32 %v327_v47 }
 0x114   :  { %v1572_v51 = vpop.eup %1571 }
 0x115   :  { %410 = vmatmul.mubr.f32.vlgmr.msra.gmra.mrb[16].mxu0 %v1572_v51  ;;  %v420_v51 = vld [vmem:[#allocation2 + $0x28] sm:$0xff] }
 0x116   :  { %1284 = vmatpush1.bf16.msra.mxu0 %v1661_v8 }
 0x117   :  { %1286 = vmatprep.subr.bf16.mxu0 %v1663_v9 }
 0x11a   :  { %1288 = vmatpush1.bf16.msra.mxu0 %v1679_v14 }
 0x11b   :  { %1290 = vmatprep.subr.bf16.mxu0 %v1682_v15 }
 0x11e   :  { %1292 = vmatpush1.bf16.msra.mxu0 %v1697_v20 }
 0x11f   :  { %1294 = vmatprep.subr.bf16.mxu0 %v1700_v21 }
 0x122   :  { %1296 = vmatpush1.bf16.msra.mxu0 %v1715_v26 }
 0x123   :  { %1298 = vmatprep.subr.bf16.mxu0 %v1721_v28 }
 0x126   :  { %1300 = vmatpush1.bf16.msra.mxu0 %v1739_v35 }
 0x127   :  { %1302 = vmatprep.subr.bf16.mxu0 %v1742_v36 }
 0x12a   :  { %1304 = vmatpush1.bf16.msra.mxu0 %v1764_v42 }
 0x12b   :  { %1306 = vmatprep.subr.bf16.mxu0 %v1768_v43 }
 0x12e   :  { %1308 = vmatpush1.bf16.msra.mxu0 %v1786_v48 }
 0x12f   :  { %1310 = vmatprep.subr.bf16.mxu0 %v1790_v49 }
 0x132   :  { %1312 = vmatpush1.bf16.msra.mxu0 %v1806_v54 }
 0x133   :  { %1314 = vmatprep.subr.bf16.mxu0 %v1810_v55 }
 0x136   :  { %1316 = vmatpush1.bf16.msra.mxu0 %v1826_v60 }
 0x137   :  { %1318 = vmatprep.subr.bf16.mxu0 %v1830_v61 }
 0x13a   :  { %1320 = vmatpush1.bf16.msra.mxu0 %v1846_v2 }
 0x13b   :  { %1322 = vmatprep.subr.bf16.mxu0 %v1850_v5 }
 0x13e   :  { %1324 = vmatpush1.bf16.msra.mxu0 %v1866_v12 }
 0x13f   :  { %1326 = vmatprep.subr.bf16.mxu0 %v1870_v13 }
 0x142   :  { %1328 = vmatpush1.bf16.msra.mxu0 %v1880_v18 }
 0x143   :  { %1378 = vmatprep.subr.bf16.mxu0 %v1650_v4 }
 0x1e8   :  { %v411_v33 = vpop.f32.mrb[16].mxu0 }
 0x1e9   :  { %v412_v38 = vadd.f32 %v411_v33, %v1965_v41  ;;  %v413_v3 = vpop.f32.mrb[17].mxu0 }
 0x1ea   :  { %v414_v40 = vadd.f32 %v413_v3, %v341_v39 }
 0x1ec   :  { %1573 = vtanh.f32 %v414_v40 }
 0x1ed   :  { %1575 = vtanh.f32 %v412_v38 }
 0x1f6   :  { %v1574_v44 = vpop.eup %1573 }
 0x1f7   :  { %v1576_v45 = vpop.eup %1575  ;;  %418 = vst.msk [vmem:[#allocation3] sm:$0xff] %vm191_vm2, %v1574_v44  ;;  %1129 = vmatprep.mubr.msk.f32.mxu1 %vm191_vm2, %v1574_v44 }
 0x1f8   :  { %489 = vmatmul.mubr.f32.vlgmr.msra.gmra.mrb[2].mxu1 %v1576_v45 }
 0x1f9   :  { %1332 = vmatpush1.bf16.msra.mxu1 %v1661_v8 }
 0x1fa   :  { %1334 = vmatprep.subr.bf16.mxu1 %v1663_v9 }
 0x1fd   :  { %1336 = vmatpush1.bf16.msra.mxu1 %v1679_v14 }
 0x1fe   :  { %v969_v37 = vld [vmem:[#allocation3] sm:$0xff]  ;;  %1338 = vmatprep.subr.bf16.mxu1 %v1682_v15 }
 0x1ff   :  { %v984_v41 = vmul.f32 %v2031_v34, %v969_v37  ;;  %v657_v37 = vld [vmem:[#allocation2 + $0x58] sm:$0xff] }
 0x201   :  { %v992_v46 = vsel %vm191_vm2, %v984_v41, 0.0  ;;  %1340 = vmatpush1.bf16.msra.mxu1 %v1697_v20 }
 0x202   :  { %993 = vadd.xlane.f32.xlu0 %v992_v46  ;;  %1342 = vmatprep.subr.bf16.mxu1 %v1700_v21 }
 0x205   :  { %1344 = vmatpush1.bf16.msra.mxu1 %v1715_v26 }
 0x206   :  { %1346 = vmatprep.subr.bf16.mxu1 %v1721_v28 }
 0x209   :  { %1348 = vmatpush1.bf16.msra.mxu1 %v1739_v35 }
 0x20a   :  { %1350 = vmatprep.subr.bf16.mxu1 %v1742_v36 }
 0x20d   :  { %1352 = vmatpush1.bf16.msra.mxu1 %v1764_v42 }
 0x20e   :  { %1354 = vmatprep.subr.bf16.mxu1 %v1768_v43 }
 0x211   :  { %1356 = vmatpush1.bf16.msra.mxu1 %v1786_v48 }
 0x212   :  { %1358 = vmatprep.subr.bf16.mxu1 %v1790_v49 }
 0x215   :  { %1360 = vmatpush1.bf16.msra.mxu1 %v1806_v54 }
 0x216   :  { %1362 = vmatprep.subr.bf16.mxu1 %v1810_v55 }
 0x219   :  { %1364 = vmatpush1.bf16.msra.mxu1 %v1826_v60 }
 0x21a   :  { %1366 = vmatprep.subr.bf16.mxu1 %v1830_v61 }
 0x21d   :  { %1368 = vmatpush1.bf16.msra.mxu1 %v1846_v2 }
 0x21e   :  { %1370 = vmatprep.subr.bf16.mxu1 %v1850_v5 }
 0x221   :  { %1372 = vmatpush1.bf16.msra.mxu1 %v1866_v12 }
 0x222   :  { %1374 = vmatprep.subr.bf16.mxu1 %v1870_v13 }
 0x225   :  { %1376 = vmatpush1.bf16.msra.mxu1 %v1880_v18 }
 0x226   :  { %1426 = vmatprep.subr.bf16.mxu1 %v1650_v4 }
 0x2cb   :  { %v490_v47 = vpop.f32.mrb[2].mxu1 }
 0x2cc   :  { %v491_v50 = vadd.f32 %v490_v47, %v1990_v53  ;;  %v492_v52 = vpop.f32.mrb[3].mxu1 }
 0x2cd   :  { %v493_v56 = vadd.f32 %v492_v52, %v420_v51 }
 0x2cf   :  { %1577 = vtanh.f32 %v493_v56 }
 0x2d0   :  { %1579 = vtanh.f32 %v491_v50 }
 0x2d9   :  { %v1578_v57 = vpop.eup %1577 }
 0x2da   :  { %v1580_v58 = vpop.eup %1579  ;;  %497 = vst.msk [vmem:[#allocation3 + $0x8] sm:$0xff] %vm191_vm2, %v1578_v57  ;;  %1130 = vmatprep.mubr.msk.f32.mxu0 %vm191_vm2, %v1578_v57 }
 0x2db   :  { %568 = vmatmul.mubr.f32.vlgmr.msra.gmra.mrb[18].mxu0 %v1580_v58  ;;  %v994_v58 = vpop.xlane.xlu0 %993 }
 0x2dc   :  { %1380 = vmatpush1.bf16.msra.mxu0 %v1661_v8 }
 0x2dd   :  { %1382 = vmatprep.subr.bf16.mxu0 %v1663_v9 }
 0x2e0   :  { %1384 = vmatpush1.bf16.msra.mxu0 %v1679_v14 }
 0x2e1   :  { %v970_v62 = vld [vmem:[#allocation3 + $0x8] sm:$0xff]  ;;  %1386 = vmatprep.subr.bf16.mxu0 %v1682_v15 }
 0x2e2   :  { %v985_v53 = vmul.f32 %v2031_v34, %v970_v62 }
 0x2e4   :  { %v995_v63 = vsel %vm191_vm2, %v985_v53, 0.0  ;;  %1388 = vmatpush1.bf16.msra.mxu0 %v1697_v20 }
 0x2e5   :  { %996 = vadd.xlane.f32.xlu0 %v995_v63  ;;  %1390 = vmatprep.subr.bf16.mxu0 %v1700_v21 }
 0x2e8   :  { %1392 = vmatpush1.bf16.msra.mxu0 %v1715_v26 }
 0x2e9   :  { %1394 = vmatprep.subr.bf16.mxu0 %v1721_v28 }
 0x2ec   :  { %1396 = vmatpush1.bf16.msra.mxu0 %v1739_v35 }
 0x2ed   :  { %1398 = vmatprep.subr.bf16.mxu0 %v1742_v36 }
 0x2f0   :  { %1400 = vmatpush1.bf16.msra.mxu0 %v1764_v42 }
 0x2f1   :  { %1402 = vmatprep.subr.bf16.mxu0 %v1768_v43 }
 0x2f4   :  { %1404 = vmatpush1.bf16.msra.mxu0 %v1786_v48 }
 0x2f5   :  { %1406 = vmatprep.subr.bf16.mxu0 %v1790_v49 }
 0x2f8   :  { %1408 = vmatpush1.bf16.msra.mxu0 %v1806_v54 }
 0x2f9   :  { %1410 = vmatprep.subr.bf16.mxu0 %v1810_v55 }
 0x2fc   :  { %1412 = vmatpush1.bf16.msra.mxu0 %v1826_v60 }
 0x2fd   :  { %1414 = vmatprep.subr.bf16.mxu0 %v1830_v61 }
 0x300   :  { %1416 = vmatpush1.bf16.msra.mxu0 %v1846_v2 }
 0x301   :  { %1418 = vmatprep.subr.bf16.mxu0 %v1850_v5 }
 0x304   :  { %1420 = vmatpush1.bf16.msra.mxu0 %v1866_v12 }
 0x305   :  { %1422 = vmatprep.subr.bf16.mxu0 %v1870_v13 }
 0x308   :  { %1424 = vmatpush1.bf16.msra.mxu0 %v1880_v18 }
 0x309   :  { %1474 = vmatprep.subr.bf16.mxu0 %v1650_v4 }
 0x372   :  { %v997_v53 = vpop.xlane.xlu0 %996 }
 0x3ae   :  { %v569_v0 = vpop.f32.mrb[18].mxu0 }
 0x3af   :  { %v570_v6 = vadd.f32 %v569_v0, %v1997_v59  ;;  %v571_v10 = vpop.f32.mrb[19].mxu0  ;;  %v334_v0 = vand.u32 127, %v35_v29 }
 0x3b0   :  { %v572_v16 = vadd.f32 %v571_v10, %v499_v7  ;;  %v1017_v7 = vstv %s2197_s5 }
 0x3b1   :  { %v1019_v10 = vadd.f32 %v1017_v7, %v997_v53 }
 0x3b2   :  { %1581 = vtanh.f32 %v572_v16 }
 0x3b3   :  { %1583 = vtanh.f32 %v570_v6 }
 0x3bc   :  { %v1582_v17 = vpop.eup %1581 }
 0x3bd   :  { %v1584_v19 = vpop.eup %1583  ;;  %576 = vst.msk [vmem:[#allocation3 + $0x10] sm:$0xff] %vm191_vm2, %v1582_v17  ;;  %1131 = vmatprep.mubr.msk.f32.mxu1 %vm191_vm2, %v1582_v17 }
 0x3be   :  { %647 = vmatmul.mubr.f32.vlgmr.msra.gmra.mrb[4].mxu1 %v1584_v19  ;;  %v1036_v19 = vsub.s32 %v334_v0, %v1952_v30 }
 0x3bf   :  { %1428 = vmatpush1.bf16.msra.mxu1 %v1661_v8 }
 0x3c0   :  { %1430 = vmatprep.subr.bf16.mxu1 %v1663_v9 }
 0x3c3   :  { %1432 = vmatpush1.bf16.msra.mxu1 %v1679_v14 }
 0x3c4   :  { %v971_v23 = vld [vmem:[#allocation3 + $0x10] sm:$0xff]  ;;  %1434 = vmatprep.subr.bf16.mxu1 %v1682_v15 }
 0x3c5   :  { %v986_v59 = vmul.f32 %v2031_v34, %v971_v23 }
 0x3c7   :  { %v998_v24 = vsel %vm191_vm2, %v986_v59, 0.0  ;;  %1436 = vmatpush1.bf16.msra.mxu1 %v1697_v20 }
 0x3c8   :  { %999 = vadd.xlane.f32.xlu1 %v998_v24  ;;  %1438 = vmatprep.subr.bf16.mxu1 %v1700_v21 }
 0x3cb   :  { %1440 = vmatpush1.bf16.msra.mxu1 %v1715_v26 }
 0x3cc   :  { %1442 = vmatprep.subr.bf16.mxu1 %v1721_v28 }
 0x3cf   :  { %1444 = vmatpush1.bf16.msra.mxu1 %v1739_v35 }
 0x3d0   :  { %1446 = vmatprep.subr.bf16.mxu1 %v1742_v36 }
 0x3d3   :  { %1448 = vmatpush1.bf16.msra.mxu1 %v1764_v42 }
 0x3d4   :  { %1450 = vmatprep.subr.bf16.mxu1 %v1768_v43 }
 0x3d7   :  { %1452 = vmatpush1.bf16.msra.mxu1 %v1786_v48 }
 0x3d8   :  { %1454 = vmatprep.subr.bf16.mxu1 %v1790_v49 }
 0x3db   :  { %1456 = vmatpush1.bf16.msra.mxu1 %v1806_v54 }
 0x3dc   :  { %1458 = vmatprep.subr.bf16.mxu1 %v1810_v55 }
 0x3df   :  { %1460 = vmatpush1.bf16.msra.mxu1 %v1826_v60 }
 0x3e0   :  { %1462 = vmatprep.subr.bf16.mxu1 %v1830_v61 }
 0x3e3   :  { %1464 = vmatpush1.bf16.msra.mxu1 %v1846_v2 }
 0x3e4   :  { %1466 = vmatprep.subr.bf16.mxu1 %v1850_v5 }
 0x3e7   :  { %1468 = vmatpush1.bf16.msra.mxu1 %v1866_v12 }
 0x3e8   :  { %1470 = vmatprep.subr.bf16.mxu1 %v1870_v13 }
 0x3eb   :  { %1472 = vmatpush1.bf16.msra.mxu1 %v1880_v18 }
 0x3ec   :  { %1522 = vmatprep.subr.bf16.mxu1 %v1650_v4 }
 0x455   :  { %v1000_v62 = vpop.xlane.xlu1 %999 }
 0x456   :  { %v1020_v16 = vadd.f32 %v1017_v7, %v1000_v62 }
 0x491   :  { %v648_v25 = vpop.f32.mrb[4].mxu1 }
 0x492   :  { %v649_v31 = vadd.f32 %v648_v25, %v2004_v1  ;;  %v650_v33 = vpop.f32.mrb[5].mxu1  ;;  %v1041_v25 = vrot.slane %v1019_v10, %v1036_v19 }
 0x493   :  { %v651_v38 = vadd.f32 %v650_v33, %v578_v32  ;;  %v1045_v32 = vrot.slane %v1020_v16, %v1036_v19 }
 0x495   :  { %1585 = vtanh.f32 %v651_v38 }
 0x496   :  { %1587 = vtanh.f32 %v649_v31 }
 0x49f   :  { %v1586_v39 = vpop.eup %1585 }
 0x4a0   :  { %v1588_v3 = vpop.eup %1587  ;;  %655 = vst.msk [vmem:[#allocation3 + $0x18] sm:$0xff] %vm191_vm2, %v1586_v39  ;;  %1132 = vmatprep.mubr.msk.f32.mxu0 %vm191_vm2, %v1586_v39 }
 0x4a1   :  { %726 = vmatmul.mubr.f32.vlgmr.msra.gmra.mrb[20].mxu0 %v1588_v3 }
 0x4a2   :  { %1476 = vmatpush1.bf16.msra.mxu0 %v1661_v8 }
 0x4a3   :  { %1478 = vmatprep.subr.bf16.mxu0 %v1663_v9 }
 0x4a6   :  { %1480 = vmatpush1.bf16.msra.mxu0 %v1679_v14 }
 0x4a7   :  { %v972_v4 = vld [vmem:[#allocation3 + $0x18] sm:$0xff]  ;;  %1482 = vmatprep.subr.bf16.mxu0 %v1682_v15 }
 0x4a8   :  { %v987_v1 = vmul.f32 %v2031_v34, %v972_v4 }
 0x4aa   :  { %v1001_v40 = vsel %vm191_vm2, %v987_v1, 0.0  ;;  %1484 = vmatpush1.bf16.msra.mxu0 %v1697_v20 }
 0x4ab   :  { %1002 = vadd.xlane.f32.xlu1 %v1001_v40  ;;  %1486 = vmatprep.subr.bf16.mxu0 %v1700_v21 }
 0x4ae   :  { %1488 = vmatpush1.bf16.msra.mxu0 %v1715_v26 }
 0x4af   :  { %1490 = vmatprep.subr.bf16.mxu0 %v1721_v28 }
 0x4b2   :  { %1492 = vmatpush1.bf16.msra.mxu0 %v1739_v35 }
 0x4b3   :  { %1494 = vmatprep.subr.bf16.mxu0 %v1742_v36 }
 0x4b6   :  { %1496 = vmatpush1.bf16.msra.mxu0 %v1764_v42 }
 0x4b7   :  { %1498 = vmatprep.subr.bf16.mxu0 %v1768_v43 }
 0x4ba   :  { %1500 = vmatpush1.bf16.msra.mxu0 %v1786_v48 }
 0x4bb   :  { %1502 = vmatprep.subr.bf16.mxu0 %v1790_v49 }
 0x4be   :  { %1504 = vmatpush1.bf16.msra.mxu0 %v1806_v54 }
 0x4bf   :  { %1506 = vmatprep.subr.bf16.mxu0 %v1810_v55 }
 0x4c2   :  { %1508 = vmatpush1.bf16.msra.mxu0 %v1826_v60 }
 0x4c3   :  { %1510 = vmatprep.subr.bf16.mxu0 %v1830_v61 }
 0x4c6   :  { %1512 = vmatpush1.bf16.msra.mxu0 %v1846_v2 }
 0x4c7   :  { %1514 = vmatprep.subr.bf16.mxu0 %v1850_v5 }
 0x4ca   :  { %1516 = vmatpush1.bf16.msra.mxu0 %v1866_v12 }
 0x4cb   :  { %1518 = vmatprep.subr.bf16.mxu0 %v1870_v13 }
 0x4ce   :  { %1520 = vmatpush1.bf16.msra.mxu0 %v1880_v18 }
 0x538   :  { %v1003_v63 = vpop.xlane.xlu1 %1002 }
 0x539   :  { %v1021_v23 = vadd.f32 %v1017_v7, %v1003_v63 }
 0x53b   :  { %v1049_v38 = vrot.slane %v1021_v23, %v1036_v19 }
 0x574   :  { %v727_v44 = vpop.f32.mrb[20].mxu0 }
 0x575   :  { %v728_v45 = vadd.f32 %v727_v44, %v2009_v11  ;;  %v729_v41 = vpop.f32.mrb[21].mxu0 }
 0x576   :  { %v730_v46 = vadd.f32 %v729_v41, %v657_v37 }
 0x578   :  { %1589 = vtanh.f32 %v730_v46 }
 0x579   :  { %1591 = vtanh.f32 %v728_v45 }
 0x582   :  { %v1590_v47 = vpop.eup %1589 }
 0x583   :  { %v1592_v50 = vpop.eup %1591  ;;  %734 = vst.msk [vmem:[#allocation3 + $0x20] sm:$0xff] %vm191_vm2, %v1590_v47  ;;  %1133 = vmatprep.mubr.msk.f32.mxu1 %vm191_vm2, %v1590_v47 }
 0x584   :  { %805 = vmatmul.mubr.f32.vlgmr.msra.gmra.mrb[6].mxu1 %v1592_v50 }
 0x585   :  { %1524 = vmatpush1.bf16.msra.mxu1 %v1661_v8 }
 0x586   :  { %1526 = vmatprep.subr.bf16.mxu1 %v1663_v9 }
 0x589   :  { %1528 = vmatpush1.bf16.msra.mxu1 %v1679_v14  ;;  %v736_v14 = vld [vmem:[#allocation2 + $0x68] sm:$0xff] }
 0x58a   :  { %v973_v51 = vld [vmem:[#allocation3 + $0x20] sm:$0xff]  ;;  %1530 = vmatprep.subr.bf16.mxu1 %v1682_v15 }
 0x58b   :  { %v988_v11 = vmul.f32 %v2031_v34, %v973_v51 }
 0x58d   :  { %v1004_v52 = vsel %vm191_vm2, %v988_v11, 0.0  ;;  %1532 = vmatpush1.bf16.msra.mxu1 %v1697_v20 }
 0x58e   :  { %1005 = vadd.xlane.f32.xlu0 %v1004_v52  ;;  %1534 = vmatprep.subr.bf16.mxu1 %v1700_v21 }
 0x591   :  { %1536 = vmatpush1.bf16.msra.mxu1 %v1715_v26 }
 0x592   :  { %1538 = vmatprep.subr.bf16.mxu1 %v1721_v28 }
 0x595   :  { %1540 = vmatpush1.bf16.msra.mxu1 %v1739_v35 }
 0x596   :  { %1542 = vmatprep.subr.bf16.mxu1 %v1742_v36 }
 0x599   :  { %1544 = vmatpush1.bf16.msra.mxu1 %v1764_v42 }
 0x59a   :  { %1546 = vmatprep.subr.bf16.mxu1 %v1768_v43 }
 0x59d   :  { %1548 = vmatpush1.bf16.msra.mxu1 %v1786_v48  ;;  %v815_v48 = vld [vmem:[#allocation2 + $0x78] sm:$0xff] }
 0x59e   :  { %1550 = vmatprep.subr.bf16.mxu1 %v1790_v49 }
 0x5a1   :  { %1552 = vmatpush1.bf16.msra.mxu1 %v1806_v54 }
 0x5a2   :  { %1554 = vmatprep.subr.bf16.mxu1 %v1810_v55 }
 0x5a5   :  { %1556 = vmatpush1.bf16.msra.mxu1 %v1826_v60 }
 0x5a6   :  { %1558 = vmatprep.subr.bf16.mxu1 %v1830_v61 }
 0x5a9   :  { %1560 = vmatpush1.bf16.msra.mxu1 %v1846_v2 }
 0x5aa   :  { %1562 = vmatprep.subr.bf16.mxu1 %v1850_v5 }
 0x5ad   :  { %1564 = vmatpush1.bf16.msra.mxu1 %v1866_v12 }
 0x5ae   :  { %1566 = vmatprep.subr.bf16.mxu1 %v1870_v13 }
 0x5b1   :  { %1568 = vmatpush1.bf16.msra.mxu1 %v1880_v18 }
 0x61b   :  { %v1006_v6 = vpop.xlane.xlu0 %1005 }
 0x61c   :  { %v1022_v24 = vadd.f32 %v1017_v7, %v1006_v6 }
 0x61e   :  { %v1053_v39 = vrot.slane %v1022_v24, %v1036_v19 }
 0x657   :  { %v806_v8 = vpop.f32.mrb[6].mxu1 }
 0x658   :  { %v807_v9 = vadd.f32 %v806_v8, %v2014_v22  ;;  %v808_v15 = vpop.f32.mrb[7].mxu1 }
 0x659   :  { %v809_v20 = vadd.f32 %v808_v15, %v736_v14 }
 0x65b   :  { %1593 = vtanh.f32 %v809_v20 }
 0x65c   :  { %1595 = vtanh.f32 %v807_v9 }
 0x665   :  { %v1594_v21 = vpop.eup %1593 }
 0x666   :  { %v1596_v26 = vpop.eup %1595  ;;  %813 = vst.msk [vmem:[#allocation3 + $0x28] sm:$0xff] %vm191_vm2, %v1594_v21  ;;  %1134 = vmatprep.mubr.msk.f32.mxu0 %vm191_vm2, %v1594_v21 }
 0x667   :  { %884 = vmatmul.mubr.f32.vlgmr.msra.gmra.mrb[22].mxu0 %v1596_v26 }
 0x66d   :  { %v974_v28 = vld [vmem:[#allocation3 + $0x28] sm:$0xff] }
 0x66e   :  { %v989_v35 = vmul.f32 %v2031_v34, %v974_v28 }
 0x670   :  { %v1007_v36 = vsel %vm191_vm2, %v989_v35, 0.0 }
 0x671   :  { %1008 = vadd.xlane.f32.xlu1 %v1007_v36 }
 0x6fe   :  { %v1009_v17 = vpop.xlane.xlu1 %1008 }
 0x6ff   :  { %v1023_v31 = vadd.f32 %v1017_v7, %v1009_v17 }
 0x701   :  { %v1057_v4 = vrot.slane %v1023_v31, %v1036_v19 }
 0x73a   :  { %v885_v42 = vpop.f32.mrb[22].mxu0 }
 0x73b   :  { %v886_v43 = vadd.f32 %v885_v42, %v2019_v27  ;;  %v887_v49 = vpop.f32.mrb[23].mxu0 }
 0x73c   :  { %v888_v54 = vadd.f32 %v887_v49, %v815_v48 }
 0x73e   :  { %1597 = vtanh.f32 %v888_v54 }
 0x73f   :  { %1599 = vtanh.f32 %v886_v43 }
 0x748   :  { %v1598_v55 = vpop.eup %1597 }
 0x749   :  { %v1600_v60 = vpop.eup %1599  ;;  %892 = vst.msk [vmem:[#allocation3 + $0x30] sm:$0xff] %vm191_vm2, %v1598_v55  ;;  %1135 = vmatprep.mubr.msk.f32.mxu1 %vm191_vm2, %v1598_v55 }
 0x74a   :  { %962 = vmatmul.mubr.f32.vlgmr.msra.gmra.mrb[8].mxu1 %v1600_v60 }
 0x750   :  { %v975_v61 = vld [vmem:[#allocation3 + $0x30] sm:$0xff] }
 0x751   :  { %v990_v2 = vmul.f32 %v2031_v34, %v975_v61 }
 0x753   :  { %v1010_v5 = vsel %vm191_vm2, %v990_v2, 0.0 }
 0x754   :  { %1011 = vadd.xlane.f32.xlu0 %v1010_v5 }
 0x7e1   :  { %v1012_v59 = vpop.xlane.xlu0 %1011 }
 0x7e2   :  { %v1024_v33 = vadd.f32 %v1017_v7, %v1012_v59 }
 0x7e4   :  { %v1061_v40 = vrot.slane %v1024_v33, %v1036_v19 }
 0x81d   :  { %v963_v12 = vpop.f32.mrb[8].mxu1 }
 0x81e   :  { %v964_v13 = vpop.f32.mrb[9].mxu1 }
 0x81f   :  { %v965_v18 = vadd.f32 %v964_v13, %v815_v48 }
 0x821   :  { %1601 = vtanh.f32 %v965_v18 }
 0x82b   :  { %v1602_v22 = vpop.eup %1601 }
 0x82c   :  { %968 = vst.msk [vmem:[#allocation3 + $0x38] sm:$0xff] %vm191_vm2, %v1602_v22 }
 0x833   :  { %v976_v27 = vld [vmem:[#allocation3 + $0x38] sm:$0xff] }
 0x834   :  { %v991_v56 = vmul.f32 %v2031_v34, %v976_v27  ;;  %v1018_v34 = vadd.f32 %v1017_v7, %v994_v58 }
 0x836   :  { %v1013_v57 = vsel %vm191_vm2, %v991_v56, 0.0  ;;  %v1037_v29 = vrot.slane %v1018_v34, %v1036_v19 }
 0x837   :  { %1014 = vadd.xlane.f32.xlu1 %v1013_v57 }
 0x838   :  { %v1067_v3 = vsel %vm1066_vm3, %v1041_v25, %v1037_v29 }
 0x839   :  { %v1069_v1 = vsel %vm1068_vm4, %v1045_v32, %v1067_v3 }
 0x83a   :  { %v1071_v44 = vsel %vm1070_vm5, %v1049_v38, %v1069_v1 }
 0x83b   :  { %v1073_v37 = vsel %vm1072_vm6, %v1053_v39, %v1071_v44 }
 0x83c   :  { %v1075_v46 = vsel %vm1074_vm7, %v1057_v4, %v1073_v37 }
 0x83d   :  { %v1077_v47 = vsel %vm1076_vm8, %v1061_v40, %v1075_v46 }
 0x8c4   :  { %v1015_v30 = vpop.xlane.xlu1 %1014 }
 0x8c5   :  { %v1025_v45 = vadd.f32 %v1017_v7, %v1015_v30 }
 0x8c7   :  { %v1065_v41 = vrot.slane %v1025_v45, %v1036_v19 }
 0x8c9   :  { %v1079_v50 = vsel %vm1078_vm9, %v1065_v41, %v1077_v47 }
 0x8ca   :  { %1081 = vxpose.xlu0.b32.start.end [1/1] (short) (narrow) %v1079_v50, 8 }
 0x94a   :  { %v1097_v51 = vpop.trf.xlu0 }
 0x94b   :  { %1114 = vst.msk [vmem:[%s2198_s6] sm:$0xff] %vm1113_vm10, %v1097_v51 }

</bundles_post_ra>
